<compile_context>
chip_gen: v6e
topology: v6e:2x2x1
jax: 0.10.0
libtpu: 0.0.40
codegen_flags: <defaults>
</compile_context>

<pallas_src>
import functools

import jax
import jax.numpy as jnp
from jax import lax
from jax.experimental import pallas as pl
from jax.experimental.pallas import tpu as pltpu

LANE = 128          # TPU lane width: every feature dim is padded to this
_NEG_BIG = -1e30    # effectively -inf for the masked softmax
_VMEM = pl.BlockSpec(memory_space=pltpu.MemorySpace.VMEM)


def _round_up(x, m):
    return ((x + m - 1) // m) * m


def _pad2(x, rows, cols, dtype=jnp.float32):
    r, c = x.shape
    return jnp.pad(jnp.asarray(x, jnp.float32),
                   ((0, rows - r), (0, cols - c))).astype(dtype)


# ---------------------------------------------------------------------------
# In-kernel helpers
# ---------------------------------------------------------------------------
def _masked_softmax(z, valid_lanes):
    """softmax(dim=1) over the first `valid_lanes` lanes; padded lanes -> 0."""
    lane_ids = lax.broadcasted_iota(jnp.int32, z.shape, 1)
    z = jnp.where(lane_ids < valid_lanes, z, _NEG_BIG)
    z = z - jnp.max(z, axis=1, keepdims=True)
    e = jnp.exp(z)
    denom = jnp.sum(e, axis=1, keepdims=True)
    return e * pl.reciprocal(denom, approx=True)      # divide on the EUP slot


# ---------------------------------------------------------------------------
# Fused per-conv-layer kernel:
#   acc_out  = acc + softmax(x @ Wout + bout)                (fingerprint upd)
#   node_out = ReLU(BN(x @ Wself
#                      + sum_d mask_d * (nbrN @ Wn_d + nbrE @ We_d) + bias))
#   (last layer only) acc_out += softmax(node_out @ Wfinal + bfinal)
# ---------------------------------------------------------------------------
def _fused_layer_kernel(*refs, n_valid, out_valid, deg_ranges, with_final):
    if with_final:
        (acc_ref, x_ref, nbr_n_ref, nbr_e_ref,
         out_w_ref, out_b_ref, self_w_ref,
         deg_wn_ref, deg_we_ref, conv_b_ref,
         final_w_ref, final_b_ref,
         acc_out_ref, node_out_ref) = refs
    else:
        (acc_ref, x_ref, nbr_n_ref, nbr_e_ref,
         out_w_ref, out_b_ref, self_w_ref,
         deg_wn_ref, deg_we_ref, conv_b_ref,
         acc_out_ref, node_out_ref) = refs
        final_w_ref = final_b_ref = None

    f32 = jnp.float32
    xb = x_ref[...].astype(jnp.bfloat16)               # bf16 into the MXU

    # (1) fingerprint update from the current node representation.
    z = jnp.dot(xb, out_w_ref[...], preferred_element_type=f32) + out_b_ref[...]
    acc = acc_ref[...] + _masked_softmax(z, out_valid)

    # (2) graph degree convolution.
    self_act = jnp.dot(xb, self_w_ref[...], preferred_element_type=f32)

    nbr_n = nbr_n_ref[...].astype(jnp.bfloat16)
    nbr_e = nbr_e_ref[...].astype(jnp.bfloat16)
    row_ids = lax.broadcasted_iota(jnp.int32, self_act.shape, 0)
    nbr_act = jnp.zeros_like(self_act)
    for d_idx, (start, stop) in enumerate(deg_ranges):     # static unroll
        if start >= stop:
            continue                    # degree-0 group contributes zeros
        act_d = (jnp.dot(nbr_n, deg_wn_ref[d_idx], preferred_element_type=f32)
                 + jnp.dot(nbr_e, deg_we_ref[d_idx], preferred_element_type=f32))
        in_group = jnp.logical_and(row_ids >= start, row_ids < stop)
        nbr_act = jnp.where(in_group, act_d, nbr_act)

    act = self_act + nbr_act + conv_b_ref[...]

    # BatchNorm1d(affine=False), training-mode stats over the real rows only.
    row_mask = (row_ids < n_valid).astype(f32)
    inv_n = 1.0 / float(n_valid)
    mean = jnp.sum(act * row_mask, axis=0, keepdims=True) * inv_n
    cent = (act - mean) * row_mask                    # padded rows -> 0
    var = jnp.sum(cent * cent, axis=0, keepdims=True) * inv_n
    node_out = jnp.maximum(cent * lax.rsqrt(var + 1e-5), 0.0)   # EUP rsqrt
    node_out_ref[...] = node_out

    # (3) last layer: fuse the final fingerprint update on node_out.
    if with_final:
        z2 = (jnp.dot(node_out.astype(jnp.bfloat16), final_w_ref[...],
                      preferred_element_type=f32) + final_b_ref[...])
        acc = acc + _masked_softmax(z2, out_valid)

    acc_out_ref[...] = acc


def _final_update_kernel(acc_ref, x_ref, w_ref, b_ref, acc_out_ref, *, out_valid):
    # Only used when there are zero conv layers.
    xb = x_ref[...].astype(jnp.bfloat16)
    z = jnp.dot(xb, w_ref[...], preferred_element_type=jnp.float32) + b_ref[...]
    acc_out_ref[...] = acc_ref[...] + _masked_softmax(z, out_valid)


# ---------------------------------------------------------------------------
# Wrappers: one pallas_call per conv layer (last one also does the final
# out-layer update).
# TODO(synk): BN statistics span all atoms, so the fused kernel is a single
#             block (no row grid). For very large graphs a two-pass /
#             cross-tile-accumulator BN with a "parallel" row grid is needed.
# ---------------------------------------------------------------------------
@functools.partial(jax.jit, static_argnames=("n_valid", "out_valid",
                                             "deg_ranges", "with_final"))
def fused_conv_layer(acc, x, nbr_n, nbr_e, layer_p, final_w, final_b, *,
                     n_valid, out_valid, deg_ranges, with_final):
    n_pad, out_pad = acc.shape
    next_pad = layer_p["self_w"].shape[1]
    kernel = functools.partial(_fused_layer_kernel, n_valid=n_valid,
                               out_valid=out_valid, deg_ranges=deg_ranges,
                               with_final=with_final)
    inputs = [acc, x, nbr_n, nbr_e,
              layer_p["out_w"], layer_p["out_b"], layer_p["self_w"],
              layer_p["deg_wn"], layer_p["deg_we"], layer_p["conv_b"]]
    if with_final:
        inputs += [final_w, final_b]
    return pl.pallas_call(
        kernel,
        out_shape=(jax.ShapeDtypeStruct((n_pad, out_pad), jnp.float32),
                   jax.ShapeDtypeStruct((n_pad, next_pad), jnp.float32)),
        in_specs=[_VMEM] * len(inputs),
        out_specs=(_VMEM, _VMEM),
        input_output_aliases={0: 0},          # acc updated in place
    )(*inputs)


@functools.partial(jax.jit, static_argnames=("out_valid",))
def final_fingerprint_update(acc, x, w, b, *, out_valid):
    kernel = functools.partial(_final_update_kernel, out_valid=out_valid)
    return pl.pallas_call(
        kernel,
        out_shape=jax.ShapeDtypeStruct(acc.shape, jnp.float32),
        in_specs=[_VMEM] * 4,
        out_specs=_VMEM,
        input_output_aliases={0: 0},
    )(acc, x, w, b)


# ---------------------------------------------------------------------------
# Plain-JAX glue: data-dependent neighbor gathers (contiguous degree blocks,
# written with dynamic_update_slice — no scatter, no concat).
# ---------------------------------------------------------------------------
def _neighbor_node_sums(node_repr_pad, graph):
    nbr = jnp.zeros_like(node_repr_pad)
    for degree, info in zip(graph["degree_list"], graph["neighbor_by_degree"]):
        if degree == 0:
            continue
        summed = jnp.take(node_repr_pad, info["node"], axis=0).sum(axis=1)
        nbr = lax.dynamic_update_slice(nbr, summed, (info["start"], 0))
    return nbr


def _neighbor_edge_sums(bond_pad, graph, n_pad):
    nbr = jnp.zeros((n_pad, bond_pad.shape[1]), jnp.float32)
    for degree, info in zip(graph["degree_list"], graph["neighbor_by_degree"]):
        if degree == 0:
            continue
        summed = jnp.take(bond_pad, info["edge"], axis=0).sum(axis=1)
        nbr = lax.dynamic_update_slice(nbr, summed, (info["start"], 0))
    return nbr


# ---------------------------------------------------------------------------
# NeuralFingerprint forward
# TODO(synk): GraphDegreeConv source was not provided — reconstructed from the
#             DeepCE repository semantics (self linear + degree-wise
#             neighbor-sum linear + bias + BN(affine=False) + ReLU).
# ---------------------------------------------------------------------------
def neural_fingerprint_forward(atom_feats, bond_feats, graph, params):
    output_size = params["output_size"]
    out_pad = _round_up(output_size, LANE)
    n_atoms = atom_feats.shape[0]
    n_pad = _round_up(n_atoms, 8)

    deg_ranges = tuple(
        (info["start"], info["start"] + info["count"]) if degree > 0 else (0, 0)
        for degree, info in zip(graph["degree_list"],
                                graph["neighbor_by_degree"]))

    node_repr = _pad2(atom_feats, n_pad, _round_up(atom_feats.shape[1], LANE))
    bond_pad = _pad2(bond_feats, bond_feats.shape[0],
                     _round_up(bond_feats.shape[1], LANE))
    nbr_e = _neighbor_edge_sums(bond_pad, graph, n_pad)   # layer-invariant

    acc = jnp.zeros((n_pad, out_pad), jnp.float32)
    num_layers = len(params["layers"])
    if num_layers == 0:
        acc = final_fingerprint_update(
            acc, node_repr, params["final_out_w"], params["final_out_b"],
            out_valid=output_size)
    else:
        for li, layer_p in enumerate(params["layers"]):
            is_last = li == num_layers - 1
            nbr_n = _neighbor_node_sums(node_repr, graph)
            acc, node_repr = fused_conv_layer(
                acc, node_repr, nbr_n, nbr_e, layer_p,
                params["final_out_w"] if is_last else None,
                params["final_out_b"] if is_last else None,
                n_valid=n_atoms, out_valid=output_size,
                deg_ranges=deg_ranges, with_final=is_last)

    atom_activations = acc[:n_atoms, :output_size]

    # scatter per-atom activations into padded (batch, max_length, out) tensor
    mol_lengths = graph["molecule_length"]
    batch_size = len(mol_lengths)
    max_length = max(mol_lengths)
    fingerprint_atom = jnp.zeros((batch_size, max_length, output_size),
                                 jnp.float32)
    start = 0
    for idx, length in enumerate(mol_lengths):
        fingerprint_atom = fingerprint_atom.at[idx, :length].set(
            atom_activations[start:start + length])
        start += length
    return fingerprint_atom


# ---------------------------------------------------------------------------
# Deterministic parameter / input construction
# ---------------------------------------------------------------------------
def _linear_init(key, fan_in, fan_out, with_bias=True):
    # mimic nn.Linear default uniform(-1/sqrt(fan_in), 1/sqrt(fan_in))
    bound = 1.0 / (fan_in ** 0.5)
    k_w, k_b = jax.random.split(key)
    w = jax.random.uniform(k_w, (fan_in, fan_out), jnp.float32, -bound, bound)
    if not with_bias:
        return w
    b = jax.random.uniform(k_b, (1, fan_out), jnp.float32, -bound, bound)
    return w, b


def build_params(key, node_size, edge_size, conv_layer_sizes, output_size,
                 degree_list):
    layer_sizes = [node_size] + list(conv_layer_sizes)
    params = {"out_layers": [], "conv_layers": []}
    keys = jax.random.split(key, len(layer_sizes) + len(conv_layer_sizes))
    k_i = 0
    for in_size in layer_sizes:
        w, b = _linear_init(keys[k_i], in_size, output_size)
        params["out_layers"].append({"w": w, "b": b})
        k_i += 1
    for prev, nxt in zip(layer_sizes[:-1], layer_sizes[1:]):
        sub = jax.random.split(keys[k_i], len(degree_list) + 1)
        conv = {
            "self_w": _linear_init(sub[0], prev, nxt, with_bias=False),
            "bias": jnp.zeros((1, nxt), jnp.float32),
            "degree_w": [
                _linear_init(sub[1 + d], prev + edge_size, nxt, with_bias=False)
                for d in range(len(degree_list))
            ],
        }
        params["conv_layers"].append(conv)
        k_i += 1
    return params


def prepare_params(raw, node_size, edge_size, conv_layer_sizes, output_size,
                   degree_list):
    """Pad weights to 128 lanes, split degree weights into node/edge parts
    (concat @ W == node @ Wn + edge @ We) and cast matmul weights to bf16."""
    layer_sizes = [node_size] + list(conv_layer_sizes)
    out_pad = _round_up(output_size, LANE)
    edge_pad = _round_up(edge_size, LANE)
    layers = []
    for li, (prev, nxt) in enumerate(zip(layer_sizes[:-1], layer_sizes[1:])):
        in_pad = _round_up(prev, LANE)
        next_pad = _round_up(nxt, LANE)
        conv = raw["conv_layers"][li]
        out_l = raw["out_layers"][li]
        deg_wn, deg_we = [], []
        for w in conv["degree_w"]:                  # (prev + edge, nxt)
            deg_wn.append(_pad2(w[:prev], in_pad, next_pad, jnp.bfloat16))
            deg_we.append(_pad2(w[prev:], edge_pad, next_pad, jnp.bfloat16))
        layers.append({
            "out_w": _pad2(out_l["w"], in_pad, out_pad, jnp.bfloat16),
            "out_b": _pad2(out_l["b"], 1, out_pad),
            "self_w": _pad2(conv["self_w"], in_pad, next_pad, jnp.bfloat16),
            "deg_wn": jnp.stack(deg_wn),
            "deg_we": jnp.stack(deg_we),
            "conv_b": _pad2(conv["bias"], 1, next_pad),
        })
    last_in_pad = _round_up(layer_sizes[-1], LANE)
    return {
        "layers": layers,
        "final_out_w": _pad2(raw["out_layers"][-1]["w"], last_in_pad, out_pad,
                             jnp.bfloat16),
        "final_out_b": _pad2(raw["out_layers"][-1]["b"], 1, out_pad),
        "output_size": output_size,
    }


def build_graph(key, num_atom, num_bond, degree_list, molecule_length):
    # atoms 0..num_atom//2-1 have degree 1, the rest degree 2 (sorted by
    # degree, so every degree group is a contiguous row range).
    group_bounds = {1: (0, num_atom // 2), 2: (num_atom // 2, num_atom)}
    neighbor_by_degree = []
    for degree in degree_list:
        start, stop = group_bounds[degree]
        count = stop - start
        k_n, k_e, key = jax.random.split(key, 3)
        node_nbr = jax.random.randint(k_n, (count, degree), 0, num_atom,
                                      jnp.int32)
        edge_nbr = jax.random.randint(k_e, (count, degree), 0, num_bond,
                                      jnp.int32)
        neighbor_by_degree.append(
            {"start": start, "count": count, "node": node_nbr, "edge": edge_nbr})
    return {
        "neighbor_by_degree": neighbor_by_degree,
        "degree_list": list(degree_list),
        "molecule_length": list(molecule_length),
    }


if __name__ == "__main__":
    # small, deterministic configuration
    node_size = 16        # atom feature dim
    edge_size = 8         # bond feature dim
    conv_layer_sizes = [32, 32]
    output_size = 32      # fingerprint length
    degree_list = [1, 2]
    molecule_length = [6, 10]           # batch_size = 2
    num_atom = sum(molecule_length)     # 16
    num_bond = 20

    key = jax.random.PRNGKey(0)
    k_params, k_graph, k_atom, k_bond = jax.random.split(key, 4)

    raw_params = build_params(k_params, node_size, edge_size, conv_layer_sizes,
                              output_size, degree_list)
    params = prepare_params(raw_params, node_size, edge_size, conv_layer_sizes,
                            output_size, degree_list)
    graph = build_graph(k_graph, num_atom, num_bond, degree_list,
                        molecule_length)

    atom_feats = jax.random.normal(k_atom, (num_atom, node_size), jnp.float32)
    bond_feats = jax.random.normal(k_bond, (num_bond, edge_size), jnp.float32)

    fingerprint = neural_fingerprint_forward(atom_feats, bond_feats, graph,
                                             params)
    fingerprint = jax.block_until_ready(fingerprint)
    assert fingerprint.shape == (len(molecule_length), max(molecule_length),
                                 output_size)
    assert bool(jnp.all(jnp.isfinite(fingerprint)))
    print("KERNEL_OK")
</pallas_src>

<mosaic_0001>
module attributes {stable_mosaic.version = 11 : i64} {
  func.func @_fused_layer_kernel(%arg0: memref<16x128xf32, #tpu.memory_space<vmem>>, %arg1: memref<16x128xf32, #tpu.memory_space<vmem>>, %arg2: memref<16x128xf32, #tpu.memory_space<vmem>>, %arg3: memref<16x128xf32, #tpu.memory_space<vmem>>, %arg4: memref<128x128xbf16, #tpu.memory_space<vmem>>, %arg5: memref<1x128xf32, #tpu.memory_space<vmem>>, %arg6: memref<128x128xbf16, #tpu.memory_space<vmem>>, %arg7: memref<2x128x128xbf16, #tpu.memory_space<vmem>>, %arg8: memref<2x128x128xbf16, #tpu.memory_space<vmem>>, %arg9: memref<1x128xf32, #tpu.memory_space<vmem>>, %arg10: memref<16x128xf32, #tpu.memory_space<vmem>>, %arg11: memref<16x128xf32, #tpu.memory_space<vmem>>) attributes {dimension_semantics = [], scalar_prefetch = 0 : i64, scratch_operands = 0 : i64, tpu.core_type = #tpu.core_type<tc>} {
    %c0 = arith.constant 0 : index
    %c0_0 = arith.constant 0 : index
    %0 = vector.load %arg1[%c0, %c0_0] : memref<16x128xf32, #tpu.memory_space<vmem>>, vector<16x128xf32>
    %1 = arith.truncf %0 : vector<16x128xf32> to vector<16x128xbf16>
    %c0_1 = arith.constant 0 : index
    %c0_2 = arith.constant 0 : index
    %2 = vector.load %arg4[%c0_1, %c0_2] : memref<128x128xbf16, #tpu.memory_space<vmem>>, vector<128x128xbf16>
    %cst = arith.constant dense<0.000000e+00> : vector<16x128xf32>
    %3 = tpu.matmul %1, %2, %cst {dimension_numbers = #tpu.dot_dimension_numbers<[1], [0], [0], [1], [0, 0, 1, 1], [], []>} : vector<16x128xbf16>, vector<128x128xbf16>, vector<16x128xf32> -> vector<16x128xf32>
    %c0_3 = arith.constant 0 : index
    %c0_4 = arith.constant 0 : index
    %4 = vector.load %arg5[%c0_3, %c0_4] : memref<1x128xf32, #tpu.memory_space<vmem>>, vector<1x128xf32>
    %5 = vector.broadcast %4 : vector<1x128xf32> to vector<16x128xf32>
    %6 = arith.addf %3, %5 : vector<16x128xf32>
    %c0_5 = arith.constant 0 : index
    %c0_6 = arith.constant 0 : index
    %7 = vector.load %arg0[%c0_5, %c0_6] : memref<16x128xf32, #tpu.memory_space<vmem>>, vector<16x128xf32>
    %8 = tpu.iota {dimensions = array<i32: 1>} : vector<16x128xi32>
    %c32_i32 = arith.constant 32 : i32
    %9 = vector.broadcast %c32_i32 : i32 to vector<16x128xi32>
    %10 = arith.cmpi slt, %8, %9 : vector<16x128xi32>
    %cst_7 = arith.constant -1.000000e+30 : f32
    %11 = vector.broadcast %cst_7 : f32 to vector<16x128xf32>
    %12 = arith.select %10, %6, %11 : vector<16x128xi1>, vector<16x128xf32>
    %cst_8 = arith.constant dense<0xFF800000> : vector<16xf32>
    %13 = vector.multi_reduction <maximumf>, %12, %cst_8 [1] : vector<16x128xf32> to vector<16xf32>
    %14 = vector.shape_cast %13 : vector<16xf32> to vector<16x1xf32>
    %15 = vector.broadcast %14 : vector<16x1xf32> to vector<16x128xf32>
    %16 = arith.subf %12, %15 : vector<16x128xf32>
    %17 = math.exp %16 : vector<16x128xf32>
    %cst_9 = arith.constant dense<0.000000e+00> : vector<16xf32>
    %18 = vector.multi_reduction <add>, %17, %cst_9 [1] : vector<16x128xf32> to vector<16xf32>
    %19 = vector.shape_cast %18 : vector<16xf32> to vector<16x1xf32>
    %20 = tpu.reciprocal %19 {approx = true} : vector<16x1xf32> -> vector<16x1xf32>
    %21 = vector.broadcast %20 : vector<16x1xf32> to vector<16x128xf32>
    %22 = arith.mulf %17, %21 : vector<16x128xf32>
    %23 = arith.addf %7, %22 : vector<16x128xf32>
    %c0_10 = arith.constant 0 : index
    %c0_11 = arith.constant 0 : index
    %24 = vector.load %arg6[%c0_10, %c0_11] : memref<128x128xbf16, #tpu.memory_space<vmem>>, vector<128x128xbf16>
    %cst_12 = arith.constant dense<0.000000e+00> : vector<16x128xf32>
    %25 = tpu.matmul %1, %24, %cst_12 {dimension_numbers = #tpu.dot_dimension_numbers<[1], [0], [0], [1], [0, 0, 1, 1], [], []>} : vector<16x128xbf16>, vector<128x128xbf16>, vector<16x128xf32> -> vector<16x128xf32>
    %c0_13 = arith.constant 0 : index
    %c0_14 = arith.constant 0 : index
    %26 = vector.load %arg2[%c0_13, %c0_14] : memref<16x128xf32, #tpu.memory_space<vmem>>, vector<16x128xf32>
    %27 = arith.truncf %26 : vector<16x128xf32> to vector<16x128xbf16>
    %c0_15 = arith.constant 0 : index
    %c0_16 = arith.constant 0 : index
    %28 = vector.load %arg3[%c0_15, %c0_16] : memref<16x128xf32, #tpu.memory_space<vmem>>, vector<16x128xf32>
    %29 = arith.truncf %28 : vector<16x128xf32> to vector<16x128xbf16>
    %30 = tpu.iota {dimensions = array<i32: 0>} : vector<16x128xi32>
    %cst_17 = arith.constant 0.000000e+00 : f32
    %31 = vector.broadcast %cst_17 : f32 to vector<16x128xf32>
    %c0_18 = arith.constant 0 : index
    %c0_19 = arith.constant 0 : index
    %c0_20 = arith.constant 0 : index
    %32 = vector.load %arg7[%c0_18, %c0_19, %c0_20] : memref<2x128x128xbf16, #tpu.memory_space<vmem>>, vector<1x128x128xbf16>
    %33 = vector.shape_cast %32 : vector<1x128x128xbf16> to vector<128x128xbf16>
    %cst_21 = arith.constant dense<0.000000e+00> : vector<16x128xf32>
    %34 = tpu.matmul %27, %33, %cst_21 {dimension_numbers = #tpu.dot_dimension_numbers<[1], [0], [0], [1], [0, 0, 1, 1], [], []>} : vector<16x128xbf16>, vector<128x128xbf16>, vector<16x128xf32> -> vector<16x128xf32>
    %c0_22 = arith.constant 0 : index
    %c0_23 = arith.constant 0 : index
    %c0_24 = arith.constant 0 : index
    %35 = vector.load %arg8[%c0_22, %c0_23, %c0_24] : memref<2x128x128xbf16, #tpu.memory_space<vmem>>, vector<1x128x128xbf16>
    %36 = vector.shape_cast %35 : vector<1x128x128xbf16> to vector<128x128xbf16>
    %cst_25 = arith.constant dense<0.000000e+00> : vector<16x128xf32>
    %37 = tpu.matmul %29, %36, %cst_25 {dimension_numbers = #tpu.dot_dimension_numbers<[1], [0], [0], [1], [0, 0, 1, 1], [], []>} : vector<16x128xbf16>, vector<128x128xbf16>, vector<16x128xf32> -> vector<16x128xf32>
    %38 = arith.addf %34, %37 : vector<16x128xf32>
    %c0_i32 = arith.constant 0 : i32
    %39 = vector.broadcast %c0_i32 : i32 to vector<16x128xi32>
    %40 = arith.cmpi sge, %30, %39 : vector<16x128xi32>
    %c8_i32 = arith.constant 8 : i32
    %41 = vector.broadcast %c8_i32 : i32 to vector<16x128xi32>
    %42 = arith.cmpi slt, %30, %41 : vector<16x128xi32>
    %43 = arith.andi %40, %42 : vector<16x128xi1>
    %44 = arith.select %43, %38, %31 : vector<16x128xi1>, vector<16x128xf32>
    %c1 = arith.constant 1 : index
    %c0_26 = arith.constant 0 : index
    %c0_27 = arith.constant 0 : index
    %45 = vector.load %arg7[%c1, %c0_26, %c0_27] : memref<2x128x128xbf16, #tpu.memory_space<vmem>>, vector<1x128x128xbf16>
    %46 = vector.shape_cast %45 : vector<1x128x128xbf16> to vector<128x128xbf16>
    %cst_28 = arith.constant dense<0.000000e+00> : vector<16x128xf32>
    %47 = tpu.matmul %27, %46, %cst_28 {dimension_numbers = #tpu.dot_dimension_numbers<[1], [0], [0], [1], [0, 0, 1, 1], [], []>} : vector<16x128xbf16>, vector<128x128xbf16>, vector<16x128xf32> -> vector<16x128xf32>
    %c1_29 = arith.constant 1 : index
    %c0_30 = arith.constant 0 : index
    %c0_31 = arith.constant 0 : index
    %48 = vector.load %arg8[%c1_29, %c0_30, %c0_31] : memref<2x128x128xbf16, #tpu.memory_space<vmem>>, vector<1x128x128xbf16>
    %49 = vector.shape_cast %48 : vector<1x128x128xbf16> to vector<128x128xbf16>
    %cst_32 = arith.constant dense<0.000000e+00> : vector<16x128xf32>
    %50 = tpu.matmul %29, %49, %cst_32 {dimension_numbers = #tpu.dot_dimension_numbers<[1], [0], [0], [1], [0, 0, 1, 1], [], []>} : vector<16x128xbf16>, vector<128x128xbf16>, vector<16x128xf32> -> vector<16x128xf32>
    %51 = arith.addf %47, %50 : vector<16x128xf32>
    %c8_i32_33 = arith.constant 8 : i32
    %52 = vector.broadcast %c8_i32_33 : i32 to vector<16x128xi32>
    %53 = arith.cmpi sge, %30, %52 : vector<16x128xi32>
    %c16_i32 = arith.constant 16 : i32
    %54 = vector.broadcast %c16_i32 : i32 to vector<16x128xi32>
    %55 = arith.cmpi slt, %30, %54 : vector<16x128xi32>
    %56 = arith.andi %53, %55 : vector<16x128xi1>
    %57 = arith.select %56, %51, %44 : vector<16x128xi1>, vector<16x128xf32>
    %58 = arith.addf %25, %57 : vector<16x128xf32>
    %c0_34 = arith.constant 0 : index
    %c0_35 = arith.constant 0 : index
    %59 = vector.load %arg9[%c0_34, %c0_35] : memref<1x128xf32, #tpu.memory_space<vmem>>, vector<1x128xf32>
    %60 = vector.broadcast %59 : vector<1x128xf32> to vector<16x128xf32>
    %61 = arith.addf %58, %60 : vector<16x128xf32>
    %c16_i32_36 = arith.constant 16 : i32
    %62 = vector.broadcast %c16_i32_36 : i32 to vector<16x128xi32>
    %63 = arith.cmpi slt, %30, %62 : vector<16x128xi32>
    %64 = arith.extui %63 : vector<16x128xi1> to vector<16x128xi32>
    %65 = arith.sitofp %64 : vector<16x128xi32> to vector<16x128xf32>
    %66 = arith.mulf %61, %65 : vector<16x128xf32>
    %cst_37 = arith.constant dense<0.000000e+00> : vector<128xf32>
    %67 = vector.multi_reduction <add>, %66, %cst_37 [0] : vector<16x128xf32> to vector<128xf32>
    %68 = vector.shape_cast %67 : vector<128xf32> to vector<1x128xf32>
    %cst_38 = arith.constant 6.250000e-02 : f32
    %69 = vector.broadcast %cst_38 : f32 to vector<1x128xf32>
    %70 = arith.mulf %68, %69 : vector<1x128xf32>
    %71 = vector.broadcast %70 : vector<1x128xf32> to vector<16x128xf32>
    %72 = arith.subf %61, %71 : vector<16x128xf32>
    %73 = arith.mulf %72, %65 : vector<16x128xf32>
    %74 = arith.mulf %73, %73 : vector<16x128xf32>
    %cst_39 = arith.constant dense<0.000000e+00> : vector<128xf32>
    %75 = vector.multi_reduction <add>, %74, %cst_39 [0] : vector<16x128xf32> to vector<128xf32>
    %76 = vector.shape_cast %75 : vector<128xf32> to vector<1x128xf32>
    %cst_40 = arith.constant 6.250000e-02 : f32
    %77 = vector.broadcast %cst_40 : f32 to vector<1x128xf32>
    %78 = arith.mulf %76, %77 : vector<1x128xf32>
    %cst_41 = arith.constant 9.99999974E-6 : f32
    %79 = vector.broadcast %cst_41 : f32 to vector<1x128xf32>
    %80 = arith.addf %78, %79 : vector<1x128xf32>
    %81 = math.rsqrt %80 : vector<1x128xf32>
    %82 = vector.broadcast %81 : vector<1x128xf32> to vector<16x128xf32>
    %83 = arith.mulf %73, %82 : vector<16x128xf32>
    %cst_42 = arith.constant 0.000000e+00 : f32
    %84 = vector.broadcast %cst_42 : f32 to vector<16x128xf32>
    %85 = arith.maximumf %83, %84 : vector<16x128xf32>
    %c0_43 = arith.constant 0 : index
    %c0_44 = arith.constant 0 : index
    %86 = vector.load %arg11[%c0_43, %c0_44] : memref<16x128xf32, #tpu.memory_space<vmem>>, vector<16x128xf32>
    tpu.vector_store %arg11[%c0_43, %c0_44], %85 {strides = array<i32>} : memref<16x128xf32, #tpu.memory_space<vmem>>, vector<16x128xf32>,
    %c0_45 = arith.constant 0 : index
    %c0_46 = arith.constant 0 : index
    %87 = vector.load %arg10[%c0_45, %c0_46] : memref<16x128xf32, #tpu.memory_space<vmem>>, vector<16x128xf32>
    tpu.vector_store %arg10[%c0_45, %c0_46], %23 {strides = array<i32>} : memref<16x128xf32, #tpu.memory_space<vmem>>, vector<16x128xf32>,
    return
  }
}

</mosaic_0001>

<bundles_post_ra>
// kernel: fused_conv_layer.1
= control target key start
LH: loop header
LB: loop body
LE: loop exit
PB: predicated region body
PF: predicated region fallthrough
CT: control target
= control target key end

     0   :  { %17 = vsyncpa [#allocation3], 0  ;;  %s1579_s0 = inlined_call_operand.hbm [shape: f32[16,128], index: 0, kind: input, shape index: {}, may-alias: {0,10}]   ;;  %s1580_s1 = inlined_call_operand.vmem [shape: f32[16,128], index: 1, kind: input, shape index: {}]   ;;  %s1581_s2 = inlined_call_operand.vmem [shape: f32[16,128], index: 2, kind: input, shape index: {}]   ;;  %s1582_s3 = inlined_call_operand.hbm [shape: f32[16,128], index: 3, kind: input, shape index: {}]   ;;  %s1583_s4 = inlined_call_operand.hbm [shape: bf16[128,128], index: 4, kind: input, shape index: {}]   ;;  %s1584_s5 = inlined_call_operand.vmem [shape: f32[1,128], index: 5, kind: input, shape index: {}]   ;;  %s1585_s6 = inlined_call_operand.hbm [shape: bf16[128,128], index: 6, kind: input, shape index: {}]   ;;  %s1586_s7 = inlined_call_operand.hbm [shape: bf16[2,128,128], index: 7, kind: input, shape index: {}]   ;;  %s1587_s8 = inlined_call_operand.hbm [shape: bf16[2,128,128], index: 8, kind: input, shape index: {}]   ;;  %s1588_s9 = inlined_call_operand.vmem [shape: f32[1,128], index: 9, kind: input, shape index: {}]   ;;  %s1589_s10 = inlined_call_operand.hbm [shape: f32[16,128], index: 10, kind: output, shape index: {0}, may-alias: {0,10}]   ;;  %s1590_s11 = inlined_call_operand.hbm [shape: f32[16,128], index: 11, kind: output, shape index: {1}]  }
   0x1   :  { %18 = vsyncpa [#allocation6], 0 }
   0x2   :  { %19 = vsyncpa [#allocation9], 0 }
   0x3   :  { %20 = vsyncpa [#allocation12], 0 }
   0x4   :  { %21 = vsyncpa [#allocation4], 0 }
   0x5   :  { %22 = vsyncpa [#allocation15], 0  ;;  %s1367_s17 = smov [#allocation5]  }
   0x6   :  { %s44_s18 = sshll.u32 %s1367_s17, 4  ;;  %s45_s18 = int_to_ptr.vmem [resolvable:$true] %s44_s18 }
   0x7   :  { %s1203_s19 = scalar_lea.vmem %s45_s18, 256  ;;  %p1208_p1 = scmp.lt.s32.totalorder %s45_s18, %s45_s18 }
   0x8   :  { %p1204_p0 = scmp.ne.s32.totalorder %s45_s18, %s1203_s19  ;;  %p1209_p2 = scmp.lt.s32.totalorder %s1203_s19, %s1203_s19 }
   0xa   :  { %p1210_p3 = por %p1209_p2, %p1208_p1 }
   0xc   :  { %p1211_p4 = pnand %p1210_p3, %p1204_p0 }
   0xe   :  { %1214 = shalt.err (!%p1211_p4)
}
   0xf   :  { %s1368_s20 = smov 128   ;;  %s1369_s21 = smov 8  }
  0x10   :  { %50 = dma.hbm_to_vmem [thread:$0]  %s1582_s3, 256, %s45_s18, [#allocation6], %s1368_s20, %s1368_s20, %s1369_s21  }
  0x11   :  { %s1370_s24 = smov [#allocation8]   ;;  %s1371_s26 = smov [#allocation2]  }
  0x12   :  { %s70_s25 = sshll.u32 %s1370_s24, 4  ;;  %s28_s27 = sshll.u32 %s1371_s26, 4  ;;  %s71_s25 = int_to_ptr.vmem [resolvable:$true] %s70_s25  ;;  %s29_s27 = int_to_ptr.vmem [resolvable:$true] %s28_s27 }
  0x13   :  { %s1223_s28 = scalar_lea.vmem %s71_s25, 1024  ;;  %p1228_p6 = scmp.lt.s32.totalorder %s71_s25, %s71_s25 }
  0x14   :  { %p1224_p5 = scmp.ne.s32.totalorder %s71_s25, %s1223_s28  ;;  %p1229_p7 = scmp.lt.s32.totalorder %s1223_s28, %s1223_s28 }
  0x16   :  { %p1230_p8 = por %p1229_p7, %p1228_p6 }
  0x18   :  { %p1231_p9 = pnand %p1230_p8, %p1224_p5 }
  0x1a   :  { %1234 = shalt.err (!%p1231_p9)
}
  0x1b   :  { %s1372_s29 = smov 64   ;;  %s1373_s30 = smov 4  }
  0x1c   :  { %76 = dma.hbm_to_vmem [thread:$0]  %s1585_s6, 1024, %s71_s25, [#allocation9], %s1372_s29, %s1372_s29, %s1373_s30  }
  0x1d   :  { %s1243_s3 = scalar_lea.vmem %s29_s27, 256  ;;  %p1248_p11 = scmp.lt.s32.totalorder %s29_s27, %s29_s27 }
  0x1e   :  { %p1244_p10 = scmp.ne.s32.totalorder %s29_s27, %s1243_s3  ;;  %p1249_p12 = scmp.lt.s32.totalorder %s1243_s3, %s1243_s3 }
  0x20   :  { %p1250_p13 = por %p1249_p12, %p1248_p11 }
  0x22   :  { %p1251_p0 = pnand %p1250_p13, %p1244_p10 }
  0x24   :  { %1254 = shalt.err (!%p1251_p0)
}
  0x25   :  { %34 = dma.hbm_to_vmem [thread:$0]  %s1579_s0, 256, %s29_s27, [#allocation3], %s1368_s20, %s1368_s20, %s1369_s21  }
  0x26   :  { %s1374_s16 = smov [#allocation7]   ;;  %s1375_s18 = smov [#allocation10]  }
  0x27   :  { %s56_s17 = sshll.u32 %s1374_s16, 4  ;;  %s82_s6 = sshll.u32 %s1375_s18, 4  ;;  %s57_s17 = int_to_ptr.vmem [resolvable:$true] %s56_s17  ;;  %s83_s6 = int_to_ptr.vmem [resolvable:$true] %s82_s6 }
  0x28   :  { %s1263_s19 = scalar_lea.vmem %s57_s17, 1024  ;;  %p1268_p2 = scmp.lt.s32.totalorder %s57_s17, %s57_s17 }
  0x29   :  { %p1264_p1 = scmp.ne.s32.totalorder %s57_s17, %s1263_s19  ;;  %p1269_p3 = scmp.lt.s32.totalorder %s1263_s19, %s1263_s19 }
  0x2b   :  { %p1270_p4 = por %p1269_p3, %p1268_p2 }
  0x2d   :  { %p1271_p5 = pnand %p1270_p4, %p1264_p1 }
  0x2f   :  { %1274 = shalt.err (!%p1271_p5)
}
  0x30   :  { %62 = dma.hbm_to_vmem [thread:$0]  %s1583_s4, 1024, %s57_s17, [#allocation6], %s1372_s29, %s1372_s29, %s1373_s30  }
  0x31   :  { %s1283_s0 = scalar_lea.vmem %s83_s6, 2048  ;;  %p1288_p7 = scmp.lt.s32.totalorder %s83_s6, %s83_s6 }
  0x32   :  { %p1284_p6 = scmp.ne.s32.totalorder %s83_s6, %s1283_s0  ;;  %p1289_p8 = scmp.lt.s32.totalorder %s1283_s0, %s1283_s0 }
  0x34   :  { %p1290_p9 = por %p1289_p8, %p1288_p7 }
  0x36   :  { %p1291_p10 = pnand %p1290_p9, %p1284_p6 }
  0x38   :  { %1294 = shalt.err (!%p1291_p10)
}
  0x39   :  { %88 = dma.hbm_to_vmem [thread:$0]  %s1586_s7, 2048, %s83_s6, [#allocation9], %s1372_s29, %s1372_s29, %s1373_s30  }
  0x3a   :  { %s1376_s26 = smov [#allocation11]  }
  0x3b   :  { %s94_s27 = sshll.u32 %s1376_s26, 4  ;;  %s95_s27 = int_to_ptr.vmem [resolvable:$true] %s94_s27 }
  0x3c   :  { %s1303_s28 = scalar_lea.vmem %s95_s27, 2048  ;;  %p1308_p12 = scmp.lt.s32.totalorder %s95_s27, %s95_s27 }
  0x3d   :  { %p1304_p11 = scmp.ne.s32.totalorder %s95_s27, %s1303_s28  ;;  %p1309_p13 = scmp.lt.s32.totalorder %s1303_s28, %s1303_s28 }
  0x3f   :  { %p1310_p0 = por %p1309_p13, %p1308_p12 }
  0x41   :  { %p1311_p1 = pnand %p1310_p0, %p1304_p11 }
  0x43   :  { %1314 = shalt.err (!%p1311_p1)
}
  0x44   :  { %100 = dma.hbm_to_vmem [thread:$0]  %s1587_s8, 2048, %s95_s27, [#allocation12], %s1372_s29, %s1372_s29, %s1373_s30  }
  0x45   :  { %1355 = dma.done.wait [#allocation3], 256  }
  0x46   :  { %1356 = vsyncadd [#allocation3], 4294967040 }
  0x47   :  { %1357 = dma.done.wait [#allocation6], 1280  }
  0x48   :  { %1358 = vsyncadd [#allocation6], 4294966016 }
  0x49   :  { %1359 = dma.done.wait [#allocation9], 3072  }
  0x4a   :  { %1360 = vsyncadd [#allocation9], 4294964224 }
  0x4b   :  { %1361 = dma.done.wait [#allocation12], 2048  }
  0x4c   :  { %1362 = vsyncadd [#allocation12], 4294965248  ;;  %v1377_v0 = vmov 0.0   ;;  %vm1378_vm0 = vmmov 0   ;;  %v1137_v1 = vld [vmem:[#allocation7 + $0x38] sm:$0xff]   ;;  %v1138_v2 = vld [vmem:[#allocation7 + $0x30] sm:$0xff]   ;;  %v239_v58 = vlaneseq }
  0x4d   :  { %1003 = vmatprep.subr.bf16.mxu0 %v1377_v0  ;;  %1019 = vmatprep.mubr.msk.bf16.mxu0 %vm1378_vm0, %v1377_v0  ;;  %v1139_v3 = vld [vmem:[#allocation7 + $0x28] sm:$0xff]   ;;  %v1145_v4 = vld [vmem:[#allocation11 + $0x38] sm:$0xff]   ;;  %v1140_v5 = vld [vmem:[#allocation7 + $0x20] sm:$0xff]  }
  0x4e   :  { %1023 = vmatprep.subr.bf16.mxu1 %v1377_v0  ;;  %1039 = vmatprep.mubr.msk.bf16.mxu1 %vm1378_vm0, %v1377_v0  ;;  %v1146_v6 = vld [vmem:[#allocation11 + $0x30] sm:$0xff]   ;;  %v1141_v7 = vld [vmem:[#allocation7 + $0x18] sm:$0xff]   ;;  %v1147_v8 = vld [vmem:[#allocation11 + $0x28] sm:$0xff]   ;;  %v240_v59 = vand.u32 127, %v239_v58 }
  0x4f   :  { %1004 = vmatpush3.bf16.msra.mxu0 %v1137_v1  ;;  %1024 = vmatpush3.bf16.msra.mxu1 %v1145_v4  ;;  %v1142_v9 = vld [vmem:[#allocation7 + $0x10] sm:$0xff]   ;;  %v1148_v10 = vld [vmem:[#allocation11 + $0x20] sm:$0xff]   ;;  %v1143_v11 = vld [vmem:[#allocation7 + $0x8] sm:$0xff]  }
  0x50   :  { %1005 = vmatprep.subr.bf16.mxu0 %v1377_v0  ;;  %1025 = vmatprep.subr.bf16.mxu1 %v1377_v0  ;;  %v1149_v12 = vld [vmem:[#allocation11 + $0x18] sm:$0xff]   ;;  %v1144_v13 = vld [vmem:[#allocation7] sm:$0xff]   ;;  %v123_v15 = vld [vmem:[%s1580_s1 + $0x8] sm:$0xff]  ;;  %vm241_vm1 = vcmp.lt.s32.totalorder %v240_v59, 32 }
  0x51   :  { %v122_v14 = vld [vmem:[%s1580_s1] sm:$0xff]  ;;  %v1150_v16 = vld [vmem:[#allocation11 + $0x10] sm:$0xff]   ;;  %v1153_v18 = vld [vmem:[#allocation10 + $0x38] sm:$0xff]  }
  0x52   :  { %v1501_v17 = vpack.c.bf16 %v123_v15, %v122_v14  ;;  %v1151_v19 = vld [vmem:[#allocation11 + $0x8] sm:$0xff]   ;;  %v1152_v20 = vld [vmem:[#allocation11] sm:$0xff]   ;;  %v283_v21 = vld [vmem:[#allocation5] sm:$0xff] }
  0x53   :  { %1006 = vmatpush3.bf16.msra.mxu0 %v1138_v2  ;;  %1026 = vmatpush3.bf16.msra.mxu1 %v1146_v6  ;;  %v1155_v22 = vld [vmem:[#allocation10 + $0x30] sm:$0xff]   ;;  %v284_v23 = vld [vmem:[#allocation5 + $0x8] sm:$0xff]  ;;  %v1157_v25 = vld [vmem:[#allocation10 + $0x28] sm:$0xff]  }
  0x54   :  { %1007 = vmatprep.subr.bf16.mxu0 %v1377_v0  ;;  %1027 = vmatprep.subr.bf16.mxu1 %v1377_v0  ;;  %v285_v24 = vpack.c.bf16 %v284_v23, %v283_v21  ;;  %v1154_v26 = vld [vmem:[#allocation11 + $0x78] sm:$0xff]   ;;  %v1159_v27 = vld [vmem:[#allocation10 + $0x20] sm:$0xff]   ;;  %v1156_v28 = vld [vmem:[#allocation11 + $0x70] sm:$0xff]  }
  0x55   :  { %v1161_v29 = vld [vmem:[#allocation10 + $0x18] sm:$0xff]   ;;  %v1158_v30 = vld [vmem:[#allocation11 + $0x68] sm:$0xff]   ;;  %v1163_v31 = vld [vmem:[#allocation10 + $0x10] sm:$0xff]  }
  0x56   :  { %v1160_v32 = vld [vmem:[#allocation11 + $0x60] sm:$0xff]   ;;  %v1165_v33 = vld [vmem:[#allocation10 + $0x8] sm:$0xff]   ;;  %v1162_v34 = vld [vmem:[#allocation11 + $0x58] sm:$0xff]  }
  0x57   :  { %1008 = vmatpush3.bf16.msra.mxu0 %v1139_v3  ;;  %1028 = vmatpush3.bf16.msra.mxu1 %v1147_v8  ;;  %v1167_v35 = vld [vmem:[#allocation10] sm:$0xff]   ;;  %v281_v37 = vld [vmem:[%s1581_s2 + $0x8] sm:$0xff]  ;;  %v1164_v38 = vld [vmem:[#allocation11 + $0x50] sm:$0xff]  }
  0x58   :  { %1009 = vmatprep.subr.bf16.mxu0 %v1377_v0  ;;  %1029 = vmatprep.subr.bf16.mxu1 %v1377_v0  ;;  %v280_v36 = vld [vmem:[%s1581_s2] sm:$0xff]  ;;  %v1169_v40 = vld [vmem:[#allocation10 + $0x78] sm:$0xff]   ;;  %v1166_v41 = vld [vmem:[#allocation11 + $0x48] sm:$0xff]  }
  0x59   :  { %v282_v39 = vpack.c.bf16 %v281_v37, %v280_v36  ;;  %v1171_v42 = vld [vmem:[#allocation10 + $0x70] sm:$0xff]   ;;  %v1168_v43 = vld [vmem:[#allocation11 + $0x40] sm:$0xff]   ;;  %v1173_v44 = vld [vmem:[#allocation10 + $0x68] sm:$0xff]  }
  0x5a   :  { %v1170_v45 = vld [vmem:[#allocation8 + $0x38] sm:$0xff]   ;;  %v1175_v46 = vld [vmem:[#allocation10 + $0x60] sm:$0xff]   ;;  %v1172_v47 = vld [vmem:[#allocation8 + $0x30] sm:$0xff]  }
  0x5b   :  { %1010 = vmatpush3.bf16.msra.mxu0 %v1140_v5  ;;  %1030 = vmatpush3.bf16.msra.mxu1 %v1148_v10  ;;  %v1177_v48 = vld [vmem:[#allocation10 + $0x58] sm:$0xff]   ;;  %v1174_v49 = vld [vmem:[#allocation8 + $0x28] sm:$0xff]   ;;  %v1179_v50 = vld [vmem:[#allocation10 + $0x50] sm:$0xff]  }
  0x5c   :  { %1011 = vmatprep.subr.bf16.mxu0 %v1377_v0  ;;  %1031 = vmatprep.subr.bf16.mxu1 %v1377_v0  ;;  %v1176_v51 = vld [vmem:[#allocation8 + $0x20] sm:$0xff]   ;;  %v1181_v52 = vld [vmem:[#allocation10 + $0x48] sm:$0xff]   ;;  %v1178_v53 = vld [vmem:[#allocation8 + $0x18] sm:$0xff]  }
  0x5d   :  { %v1183_v54 = vld [vmem:[#allocation10 + $0x40] sm:$0xff]   ;;  %v1180_v55 = vld [vmem:[#allocation8 + $0x10] sm:$0xff]   ;;  %v1182_v56 = vld [vmem:[#allocation8 + $0x8] sm:$0xff]  }
  0x5e   :  { %v1184_v57 = vld [vmem:[#allocation8] sm:$0xff]  }
  0x5f   :  { %1012 = vmatpush3.bf16.msra.mxu0 %v1141_v7  ;;  %1032 = vmatpush3.bf16.msra.mxu1 %v1149_v12  ;;  %v899_v60 = vld [vmem:[%s1584_s5] ss:$0 sm:$0xff] }
  0x60   :  { %1013 = vmatprep.subr.bf16.mxu0 %v1377_v0  ;;  %1033 = vmatprep.subr.bf16.mxu1 %v1377_v0 }
  0x63   :  { %1014 = vmatpush3.bf16.msra.mxu0 %v1142_v9  ;;  %1034 = vmatpush3.bf16.msra.mxu1 %v1150_v16 }
  0x64   :  { %1015 = vmatprep.subr.bf16.mxu0 %v1377_v0  ;;  %1035 = vmatprep.subr.bf16.mxu1 %v1377_v0 }
  0x67   :  { %1016 = vmatpush3.bf16.msra.mxu0 %v1143_v11  ;;  %1036 = vmatpush3.bf16.msra.mxu1 %v1151_v19 }
  0x68   :  { %1017 = vmatprep.subr.bf16.mxu0 %v1377_v0  ;;  %1037 = vmatprep.subr.bf16.mxu1 %v1377_v0 }
  0x6b   :  { %1018 = vmatpush3.bf16.msra.mxu0 %v1144_v13  ;;  %1038 = vmatpush3.bf16.msra.mxu1 %v1152_v20 }
  0x6c   :  { %1043 = vmatprep.subr.bf16.mxu0 %v1377_v0  ;;  %1063 = vmatprep.subr.bf16.mxu1 %v1377_v0 }
  0x6e   :  { %1020 = vmatmul.mubr.bf16.vlgmr.msra.gmra.mxu0 %v1501_v17  ;;  %1040 = vmatmul.mubr.bf16.vlgmr.msra.gmra.mxu1 %v285_v24 }
  0x6f   :  { %1044 = vmatpush3.bf16.msra.mxu0 %v1153_v18  ;;  %1059 = vmatprep.mubr.msk.bf16.mxu0 %vm1378_vm0, %v1377_v0 }
  0x70   :  { %1045 = vmatprep.subr.bf16.mxu0 %v1377_v0  ;;  %1064 = vmatpush3.bf16.msra.mxu1 %v1154_v26 }
  0x71   :  { %1065 = vmatprep.subr.bf16.mxu1 %v1377_v0  ;;  %1079 = vmatprep.mubr.msk.bf16.mxu1 %vm1378_vm0, %v1377_v0 }
  0x73   :  { %1046 = vmatpush3.bf16.msra.mxu0 %v1155_v22 }
  0x74   :  { %1047 = vmatprep.subr.bf16.mxu0 %v1377_v0  ;;  %1066 = vmatpush3.bf16.msra.mxu1 %v1156_v28 }
  0x75   :  { %1067 = vmatprep.subr.bf16.mxu1 %v1377_v0 }
  0x77   :  { %1048 = vmatpush3.bf16.msra.mxu0 %v1157_v25  ;;  %v948_v25 = vld [vmem:[%s1588_s9] ss:$0 sm:$0xff]  ;;  %s1379_s9 = smov [#allocation14]  }
  0x78   :  { %1049 = vmatprep.subr.bf16.mxu0 %v1377_v0  ;;  %1068 = vmatpush3.bf16.msra.mxu1 %v1158_v30  ;;  %s880_s17 = sshll.u32 %s1379_s9, 4  ;;  %s881_s17 = int_to_ptr.vmem [resolvable:$true] %s880_s17 }
  0x79   :  { %1069 = vmatprep.subr.bf16.mxu1 %v1377_v0  ;;  %s1315_s18 = scalar_lea.vmem %s881_s17, 256  ;;  %p1320_p3 = scmp.lt.s32.totalorder %s881_s17, %s881_s17 }
  0x7a   :  { %p1316_p2 = scmp.ne.s32.totalorder %s881_s17, %s1315_s18  ;;  %p1321_p4 = scmp.lt.s32.totalorder %s1315_s18, %s1315_s18 }
  0x7b   :  { %1050 = vmatpush3.bf16.msra.mxu0 %v1159_v27 }
  0x7c   :  { %1051 = vmatprep.subr.bf16.mxu0 %v1377_v0  ;;  %1070 = vmatpush3.bf16.msra.mxu1 %v1160_v32  ;;  %p1322_p5 = por %p1321_p4, %p1320_p3 }
  0x7d   :  { %1071 = vmatprep.subr.bf16.mxu1 %v1377_v0 }
  0x7e   :  { %p1323_p6 = pnand %p1322_p5, %p1316_p2 }
  0x7f   :  { %1052 = vmatpush3.bf16.msra.mxu0 %v1161_v29 }
  0x80   :  { %1053 = vmatprep.subr.bf16.mxu0 %v1377_v0  ;;  %1072 = vmatpush3.bf16.msra.mxu1 %v1162_v34 }
  0x81   :  { %1073 = vmatprep.subr.bf16.mxu1 %v1377_v0 }
  0x83   :  { %1054 = vmatpush3.bf16.msra.mxu0 %v1163_v31 }
  0x84   :  { %1055 = vmatprep.subr.bf16.mxu0 %v1377_v0  ;;  %1074 = vmatpush3.bf16.msra.mxu1 %v1164_v38 }
  0x85   :  { %1075 = vmatprep.subr.bf16.mxu1 %v1377_v0 }
  0x87   :  { %1056 = vmatpush3.bf16.msra.mxu0 %v1165_v33 }
  0x88   :  { %1057 = vmatprep.subr.bf16.mxu0 %v1377_v0  ;;  %1076 = vmatpush3.bf16.msra.mxu1 %v1166_v41 }
  0x89   :  { %1077 = vmatprep.subr.bf16.mxu1 %v1377_v0 }
  0x8b   :  { %1058 = vmatpush3.bf16.msra.mxu0 %v1167_v35 }
  0x8c   :  { %1083 = vmatprep.subr.bf16.mxu0 %v1377_v0  ;;  %1078 = vmatpush3.bf16.msra.mxu1 %v1168_v43 }
  0x8d   :  { %1103 = vmatprep.subr.bf16.mxu1 %v1377_v0 }
  0x8e   :  { %1060 = vmatmul.mubr.bf16.vlgmr.msra.gmra.mxu0 %v282_v39 }
  0x8f   :  { %1084 = vmatpush3.bf16.msra.mxu0 %v1169_v40  ;;  %1099 = vmatprep.mubr.msk.bf16.mxu0 %vm1378_vm0, %v1377_v0 }
  0x90   :  { %1085 = vmatprep.subr.bf16.mxu0 %v1377_v0  ;;  %1080 = vmatmul.mubr.bf16.vlgmr.msra.gmra.mxu1 %v285_v24 }
  0x91   :  { %1104 = vmatpush3.bf16.msra.mxu1 %v1170_v45  ;;  %1119 = vmatprep.mubr.msk.bf16.mxu1 %vm1378_vm0, %v1377_v0 }
  0x92   :  { %1105 = vmatprep.subr.bf16.mxu1 %v1377_v0 }
  0x93   :  { %1086 = vmatpush3.bf16.msra.mxu0 %v1171_v42 }
  0x94   :  { %1087 = vmatprep.subr.bf16.mxu0 %v1377_v0 }
  0x95   :  { %1106 = vmatpush3.bf16.msra.mxu1 %v1172_v47 }
  0x96   :  { %1107 = vmatprep.subr.bf16.mxu1 %v1377_v0 }
  0x97   :  { %1088 = vmatpush3.bf16.msra.mxu0 %v1173_v44 }
  0x98   :  { %1089 = vmatprep.subr.bf16.mxu0 %v1377_v0 }
  0x99   :  { %1108 = vmatpush3.bf16.msra.mxu1 %v1174_v49 }
  0x9a   :  { %1109 = vmatprep.subr.bf16.mxu1 %v1377_v0 }
  0x9b   :  { %1090 = vmatpush3.bf16.msra.mxu0 %v1175_v46 }
  0x9c   :  { %1091 = vmatprep.subr.bf16.mxu0 %v1377_v0 }
  0x9d   :  { %1110 = vmatpush3.bf16.msra.mxu1 %v1176_v51 }
  0x9e   :  { %1111 = vmatprep.subr.bf16.mxu1 %v1377_v0 }
  0x9f   :  { %1092 = vmatpush3.bf16.msra.mxu0 %v1177_v48 }
  0xa0   :  { %1093 = vmatprep.subr.bf16.mxu0 %v1377_v0 }
  0xa1   :  { %1112 = vmatpush3.bf16.msra.mxu1 %v1178_v53 }
  0xa2   :  { %1113 = vmatprep.subr.bf16.mxu1 %v1377_v0 }
  0xa3   :  { %1094 = vmatpush3.bf16.msra.mxu0 %v1179_v50 }
  0xa4   :  { %1095 = vmatprep.subr.bf16.mxu0 %v1377_v0 }
  0xa5   :  { %1114 = vmatpush3.bf16.msra.mxu1 %v1180_v55 }
  0xa6   :  { %1115 = vmatprep.subr.bf16.mxu1 %v1377_v0 }
  0xa7   :  { %1096 = vmatpush3.bf16.msra.mxu0 %v1181_v52 }
  0xa8   :  { %1097 = vmatprep.subr.bf16.mxu0 %v1377_v0 }
  0xa9   :  { %1116 = vmatpush3.bf16.msra.mxu1 %v1182_v56 }
  0xaa   :  { %1117 = vmatprep.subr.bf16.mxu1 %v1377_v0 }
  0xab   :  { %1098 = vmatpush3.bf16.msra.mxu0 %v1183_v54 }
  0xad   :  { %1118 = vmatpush3.bf16.msra.mxu1 %v1184_v57 }
  0xae   :  { %1100 = vmatmul.mubr.bf16.vlgmr.msra.gmra.mxu0 %v282_v39 }
  0xb0   :  { %1120 = vmatmul.mubr.bf16.vlgmr.msra.gmra.mxu1 %v1501_v17 }
 0x12e   :  { %v230_v61 = vpop.f32.mrf.mxu0  ;;  %v403_v5 = vpop.f32.mrf.mxu1 }
 0x12f   :  { %v231_v62 = vadd.f32 %v899_v60, %v230_v61 }
 0x130   :  { %v1021_v63 = vpop.f32.mrf.mxu0  ;;  %v1041_v6 = vpop.f32.mrf.mxu1 }
 0x131   :  { %v1556_v1 = vsel %vm241_vm1, %v231_v62, -1e+30 }
 0x132   :  { %244 = vmax.xlane.f32.xlu0 %v1556_v1  ;;  %v233_v2 = vpop.f32.mrf.mxu0  ;;  %v406_v7 = vpop.f32.mrf.mxu1 }
 0x133   :  { %v234_v3 = vadd.f32 %v899_v60, %v233_v2 }
 0x134   :  { %v1022_v0 = vpop.f32.mrf.mxu0  ;;  %v1042_v8 = vpop.f32.mrf.mxu1 }
 0x135   :  { %v1559_v4 = vsel %vm241_vm1, %v234_v3, -1e+30 }
 0x136   :  { %246 = vmax.xlane.f32.xlu0 %v1559_v4 }
 0x14e   :  { %v492_v9 = vpop.f32.mrf.mxu0 }
 0x14f   :  { %v493_v20 = vadd.f32 %v492_v9, %v403_v5 }
 0x150   :  { %v1061_v10 = vpop.f32.mrf.mxu0  ;;  %v623_v13 = vpop.f32.mrf.mxu1 }
 0x152   :  { %v495_v11 = vpop.f32.mrf.mxu0  ;;  %v1081_v14 = vpop.f32.mrf.mxu1 }
 0x154   :  { %v1062_v12 = vpop.f32.mrf.mxu0  ;;  %v626_v15 = vpop.f32.mrf.mxu1 }
 0x156   :  { %v1082_v16 = vpop.f32.mrf.mxu1 }
 0x16e   :  { %v712_v17 = vpop.f32.mrf.mxu0 }
 0x170   :  { %v1101_v18 = vpop.f32.mrf.mxu0  ;;  %v809_v22 = vpop.f32.mrf.mxu1 }
 0x171   :  { %v810_v23 = vadd.f32 %v809_v22, %v493_v20 }
 0x172   :  { %v715_v19 = vpop.f32.mrf.mxu0  ;;  %v1121_v26 = vpop.f32.mrf.mxu1 }
 0x173   :  { %v716_v24 = vadd.f32 %v715_v19, %v626_v15  ;;  %v823_v28 = vadd.f32 %v948_v25, %v810_v23 }
 0x174   :  { %v1102_v21 = vpop.f32.mrf.mxu0  ;;  %v812_v27 = vpop.f32.mrf.mxu1 }
 0x175   :  { %v813_v29 = vadd.f32 %v812_v27, %v716_v24 }
 0x176   :  { %v1122_v30 = vpop.f32.mrf.mxu1 }
 0x177   :  { %v824_v31 = vadd.f32 %v948_v25, %v813_v29 }
 0x179   :  { %v831_v32 = vadd.f32 %v824_v31, %v823_v28 }
 0x17b   :  { %v832_v33 = vrot.slane %v831_v32, 4 }
 0x17d   :  { %v833_v34 = vadd.f32 %v832_v33, %v831_v32 }
 0x17f   :  { %v834_v35 = vrot.slane %v833_v34, 2 }
 0x181   :  { %v835_v36 = vadd.f32 %v834_v35, %v833_v34 }
 0x183   :  { %v836_v37 = vrot.slane %v835_v36, 1 }
 0x185   :  { %v837_v38 = vadd.f32 %v836_v37, %v835_v36 }
 0x187   :  { %v838_v39 = vmul.f32 0.0625, %v837_v38 }
 0x189   :  { %v840_v40 = vsub.f32 %v824_v31, %v838_v39  ;;  %v839_v41 = vsub.f32 %v823_v28, %v838_v39 }
 0x18b   :  { %v844_v42 = vmul.f32 %v840_v40, %v840_v40  ;;  %v843_v43 = vmul.f32 %v839_v41, %v839_v41 }
 0x18d   :  { %v845_v44 = vadd.f32 %v844_v42, %v843_v43 }
 0x18f   :  { %v846_v45 = vrot.slane %v845_v44, 4 }
 0x191   :  { %v847_v46 = vadd.f32 %v846_v45, %v845_v44 }
 0x193   :  { %v848_v47 = vrot.slane %v847_v46, 2 }
 0x195   :  { %v849_v48 = vadd.f32 %v848_v47, %v847_v46 }
 0x197   :  { %v850_v49 = vrot.slane %v849_v48, 1 }
 0x199   :  { %v851_v50 = vadd.f32 %v850_v49, %v849_v48 }
 0x19b   :  { %v852_v51 = vmul.f32 0.0625, %v851_v50 }
 0x19d   :  { %v853_v52 = vadd.f32 1e-05, %v852_v51 }
 0x19f   :  { %1185 = vrsqrt.f32 %v853_v52 }
 0x1ac   :  { %v1186_v53 = vpop.eup %1185 }
 0x1ad   :  { %v855_v54 = vmul.f32 %v1186_v53, %v839_v41  ;;  %v856_v55 = vmul.f32 %v1186_v53, %v840_v40 }
 0x1af   :  { %v857_v56 = vmax.f32 %v855_v54, 0.0  ;;  %v858_v57 = vmax.f32 %v856_v55, 0.0 }
 0x1b1   :  { %859 = vst [vmem:[#allocation14] sm:$0xff] %v857_v56  ;;  %860 = vst [vmem:[#allocation14 + $0x8] sm:$0xff] %v858_v57 }
 0x1bb   :  { %v245_v58 = vpop.xlane.xlu0 %244 }
 0x1bc   :  { %v248_v59 = vsub.f32 %v1556_v1, %v245_v58 }
 0x1be   :  { %v250_v60 = vmul.f32 1.442695, %v248_v59 }
 0x1bf   :  { %v247_v61 = vpop.xlane.xlu0 %246 }
 0x1c0   :  { %1187 = vpow2.f32 %v250_v60  ;;  %v249_v62 = vsub.f32 %v1559_v4, %v247_v61 }
 0x1c2   :  { %v252_v63 = vmul.f32 1.442695, %v249_v62 }
 0x1c4   :  { %1189 = vpow2.f32 %v252_v63 }
 0x1cd   :  { %v1188_v2 = vpop.eup %1187 }
 0x1ce   :  { %254 = vadd.xlane.f32.xlu1 %v1188_v2 }
 0x1d1   :  { %v1190_v3 = vpop.eup %1189 }
 0x1d2   :  { %256 = vadd.xlane.f32.xlu1 %v1190_v3 }
 0x1d3   :  { %1326 = shalt.err (!%p1323_p6)
}
 0x1d4   :  { %886 = dma.vmem_to_hbm [thread:$0]  %s881_s17, 256, %s1590_s11, [#allocation15], %s1368_s20, %s1368_s20, %s1369_s21   ;;  %v237_v5 = vld [vmem:[#allocation2] sm:$0xff]  ;;  %v238_v9 = vld [vmem:[#allocation2 + $0x8] sm:$0xff] }
 0x1d5   :  { %s1380_s22 = smov [#allocation13]  }
 0x1d6   :  { %s868_s23 = sshll.u32 %s1380_s22, 4  ;;  %s869_s23 = int_to_ptr.vmem [resolvable:$true] %s868_s23 }
 0x1d7   :  { %s1335_s0 = scalar_lea.vmem %s869_s23, 256  ;;  %p1340_p8 = scmp.lt.s32.totalorder %s869_s23, %s869_s23 }
 0x1d8   :  { %p1336_p7 = scmp.ne.s32.totalorder %s869_s23, %s1335_s0  ;;  %p1341_p9 = scmp.lt.s32.totalorder %s1335_s0, %s1335_s0 }
 0x1da   :  { %p1342_p10 = por %p1341_p9, %p1340_p8 }
 0x1dc   :  { %p1343_p11 = pnand %p1342_p10, %p1336_p7 }
 0x257   :  { %v255_v1 = vpop.xlane.xlu1 %254 }
 0x258   :  { %1191 = vrcp.f32 %v255_v1 }
 0x25b   :  { %v257_v0 = vpop.xlane.xlu1 %256 }
 0x25c   :  { %1193 = vrcp.f32 %v257_v0 }
 0x265   :  { %v1192_v4 = vpop.eup %1191 }
 0x266   :  { %v260_v6 = vmul.f32 %v1192_v4, %v1188_v2 }
 0x268   :  { %v262_v7 = vadd.f32 %v260_v6, %v237_v5 }
 0x269   :  { %v1194_v8 = vpop.eup %1193 }
 0x26a   :  { %v261_v10 = vmul.f32 %v1194_v8, %v1190_v3  ;;  %861 = vst [vmem:[#allocation13] sm:$0xff] %v262_v7 }
 0x26c   :  { %v263_v11 = vadd.f32 %v261_v10, %v238_v9 }
 0x26e   :  { %862 = vst [vmem:[#allocation13 + $0x8] sm:$0xff] %v263_v11 }
 0x26f   :  { %1346 = shalt.err (!%p1343_p11)
}
 0x270   :  { %874 = dma.vmem_to_hbm [thread:$0]  %s869_s23, 256, %s1589_s10, [#allocation4], %s1368_s20, %s1368_s20, %s1369_s21  }
 0x271   :  { %1363 = dma.done.wait [#allocation4], 256  }
 0x272   :  { %1364 = vsyncadd [#allocation4], 4294967040 }
 0x273   :  { %1365 = dma.done.wait [#allocation15], 256  }
 0x274   :  { %1366 = vsyncadd [#allocation15], 4294967040 }
 0x275   :  { %893 = vsyncpa [#allocation3], 1 }
 0x276   :  { %894 = vsyncpa [#allocation6], 1 }
 0x277   :  { %895 = vsyncpa [#allocation9], 1 }
 0x278   :  { %896 = vsyncpa [#allocation12], 1 }
 0x279   :  { %897 = vsyncpa [#allocation4], 1 }
 0x27a   :  { %898 = vsyncpa [#allocation15], 1 }

</bundles_post_ra>
